<compile_context>
chip_gen: v7x
topology: tpu7x:2x2x1
jax: 0.10.0
libtpu: 0.0.40
codegen_flags: <defaults>
</compile_context>

<pallas_src>
import jax
import jax.numpy as jnp
from jax.experimental import pallas as pl
from jax.experimental.pallas import tpu as pltpu


def _leaky_relu(x, slope=0.2):
    return jnp.where(x >= 0, x, slope * x)


def _round_up(n, m):
    return ((n + m - 1) // m) * m


def _pad2(a, rows, cols):
    """Zero-pad a 2-D array up to (rows, cols)."""
    return jnp.pad(a, ((0, rows - a.shape[0]), (0, cols - a.shape[1])))


def decoder_kernel(x_ref, w1_ref, b1_ref, w2_ref, b2_ref, w3_ref, b3_ref, o_ref):
    # x / weights are bf16; dots accumulate in f32 on the MXU; epilogue in f32.
    x = x_ref[...]

    h = jnp.dot(x, w1_ref[...], preferred_element_type=jnp.float32) + b1_ref[...]
    h = _leaky_relu(h).astype(jnp.bfloat16)

    h = jnp.dot(h, w2_ref[...], preferred_element_type=jnp.float32) + b2_ref[...]
    h = _leaky_relu(h).astype(jnp.bfloat16)

    logits = jnp.dot(h, w3_ref[...], preferred_element_type=jnp.float32) + b3_ref[...]
    o_ref[...] = jax.nn.sigmoid(logits).astype(o_ref.dtype)


def decoder_forward(x, params):
    """x: [B, latent_dim] float32; params: dict of f32 weights/biases (W: [in, out])."""
    w1, b1 = params["w1"], params["b1"]
    w2, b2 = params["w2"], params["b2"]
    w3, b3 = params["w3"], params["b3"]

    B = x.shape[0]
    latent_dim, hidden_dim = w1.shape
    out_dim = w3.shape[1]

    # Hardware-native padded shapes (lane dim multiples of 128).
    Kp = _round_up(latent_dim, 128)
    Hp = _round_up(hidden_dim, 128)
    Np = _round_up(out_dim, 128)

    # Batch tile: 256 rows for large batches, otherwise a single 16-aligned tile
    # (16 = bf16 sublane pack).
    TB = 256 if B >= 256 else _round_up(B, 16)
    Bp = _round_up(B, TB)
    grid = (Bp // TB,)

    # Zero-pad and cast matmul operands to bf16 (halves DMA bytes, native MXU path).
    xp = _pad2(x, Bp, Kp).astype(jnp.bfloat16)
    w1p = _pad2(w1, Kp, Hp).astype(jnp.bfloat16)
    w2p = _pad2(w2, Hp, Hp).astype(jnp.bfloat16)
    w3p = _pad2(w3, Hp, Np).astype(jnp.bfloat16)
    # Biases stay f32 (added post-accumulation). Padded columns are zero.
    b1p = _pad2(b1, 1, Hp)
    b2p = _pad2(b2, 1, Hp)
    b3p = _pad2(b3, 1, Np)

    # Weights/biases: same block for every grid step -> VMEM-resident.
    resident = lambda shape: pl.BlockSpec(shape, lambda i: (0, 0))

    cost = pl.CostEstimate(
        flops=2 * Bp * (Kp * Hp + Hp * Hp + Hp * Np),
        transcendentals=Bp * Np,  # sigmoid
        bytes_accessed=(
            xp.size * 2
            + (w1p.size + w2p.size + w3p.size) * 2
            + (b1p.size + b2p.size + b3p.size) * 4
            + Bp * Np * 4
        ),
    )

    out = pl.pallas_call(
        decoder_kernel,
        out_shape=jax.ShapeDtypeStruct((Bp, Np), jnp.float32),
        grid=grid,
        in_specs=[
            pl.BlockSpec((TB, Kp), lambda i: (i, 0)),
            resident((Kp, Hp)), resident((1, Hp)),
            resident((Hp, Hp)), resident((1, Hp)),
            resident((Hp, Np)), resident((1, Np)),
        ],
        out_specs=pl.BlockSpec((TB, Np), lambda i: (i, 0)),
        compiler_params=pltpu.CompilerParams(
            dimension_semantics=("parallel",),
        ),
        cost_estimate=cost,
    )(xp, w1p, b1p, w2p, b2p, w3p, b3p)

    # Strip batch / output padding.
    return out[:B, :out_dim]


def init_params(key, latent_dim, hidden_dim, output_dim):
    """Deterministic init mimicking nn.Linear's uniform(-1/sqrt(fan_in), ...)."""
    ks = jax.random.split(key, 6)

    def linear(kw, kb, fan_in, fan_out):
        bound = 1.0 / jnp.sqrt(fan_in)
        # stored as [in, out] so the kernel computes x @ W + b
        w = jax.random.uniform(kw, (fan_in, fan_out), jnp.float32, -bound, bound)
        b = jax.random.uniform(kb, (1, fan_out), jnp.float32, -bound, bound)
        return w, b

    w1, b1 = linear(ks[0], ks[1], latent_dim, hidden_dim)
    w2, b2 = linear(ks[2], ks[3], hidden_dim, hidden_dim)
    w3, b3 = linear(ks[4], ks[5], hidden_dim, output_dim)
    return {"w1": w1, "b1": b1, "w2": w2, "b2": b2, "w3": w3, "b3": b3}


def decoder_reference(x, p):
    """Pure-JAX f32 reference (matches the PyTorch module)."""
    h = _leaky_relu(x @ p["w1"] + p["b1"])
    h = _leaky_relu(h @ p["w2"] + p["b2"])
    return jax.nn.sigmoid(h @ p["w3"] + p["b3"])


if __name__ == "__main__":
    latent_dim, hidden_dim, output_dim = 16, 32, 64
    batch = 8

    key = jax.random.PRNGKey(0)
    kx, kp = jax.random.split(key)
    x = jax.random.normal(kx, (batch, latent_dim), jnp.float32)
    params = init_params(kp, latent_dim, hidden_dim, output_dim)

    out = decoder_forward(x, params)
    out = jax.block_until_ready(out)

    ref = decoder_reference(x, params)
    assert out.shape == (batch, output_dim)
    # Kernel runs bf16 matmul inputs with f32 accumulation; sigmoid outputs are
    # in (0, 1), so a ~1e-2 absolute tolerance vs. the f32 reference is tight.
    assert jnp.allclose(out, ref, atol=2e-2, rtol=2e-2), "mismatch vs reference"

    print("KERNEL_OK")
</pallas_src>

<mosaic_0001>
module attributes {stable_mosaic.version = 11 : i64} {
  func.func @decoder_kernel(%arg0: i32, %arg1: memref<16x128xbf16, #tpu.memory_space<vmem>>, %arg2: memref<128x128xbf16, #tpu.memory_space<vmem>>, %arg3: memref<1x128xf32, #tpu.memory_space<vmem>>, %arg4: memref<128x128xbf16, #tpu.memory_space<vmem>>, %arg5: memref<1x128xf32, #tpu.memory_space<vmem>>, %arg6: memref<128x128xbf16, #tpu.memory_space<vmem>>, %arg7: memref<1x128xf32, #tpu.memory_space<vmem>>, %arg8: memref<16x128xf32, #tpu.memory_space<vmem>>) attributes {dimension_semantics = [#tpu.dimension_semantics<parallel>], iteration_bounds = array<i64: 1>, scalar_prefetch = 0 : i64, scratch_operands = 0 : i64, tpu.core_type = #tpu.core_type<tc>, window_params = [{transform_indices = @transform_0, window_bounds = array<i64: 16, 128>}, {pipeline_mode = #tpu.pipeline_mode<synchronous>, transform_indices = @transform_1, window_bounds = array<i64: 128, 128>}, {pipeline_mode = #tpu.pipeline_mode<synchronous>, transform_indices = @transform_2, window_bounds = array<i64: 1, 128>}, {pipeline_mode = #tpu.pipeline_mode<synchronous>, transform_indices = @transform_3, window_bounds = array<i64: 128, 128>}, {pipeline_mode = #tpu.pipeline_mode<synchronous>, transform_indices = @transform_4, window_bounds = array<i64: 1, 128>}, {pipeline_mode = #tpu.pipeline_mode<synchronous>, transform_indices = @transform_5, window_bounds = array<i64: 128, 128>}, {pipeline_mode = #tpu.pipeline_mode<synchronous>, transform_indices = @transform_6, window_bounds = array<i64: 1, 128>}, {transform_indices = @transform_7, window_bounds = array<i64: 16, 128>}]} {
    %c0 = arith.constant 0 : index
    %c0_0 = arith.constant 0 : index
    %0 = vector.load %arg1[%c0, %c0_0] : memref<16x128xbf16, #tpu.memory_space<vmem>>, vector<16x128xbf16>
    %c0_1 = arith.constant 0 : index
    %c0_2 = arith.constant 0 : index
    %1 = vector.load %arg2[%c0_1, %c0_2] : memref<128x128xbf16, #tpu.memory_space<vmem>>, vector<128x128xbf16>
    %cst = arith.constant dense<0.000000e+00> : vector<16x128xf32>
    %2 = tpu.matmul %0, %1, %cst {dimension_numbers = #tpu.dot_dimension_numbers<[1], [0], [0], [1], [0, 0, 1, 1], [], []>} : vector<16x128xbf16>, vector<128x128xbf16>, vector<16x128xf32> -> vector<16x128xf32>
    %c0_3 = arith.constant 0 : index
    %c0_4 = arith.constant 0 : index
    %3 = vector.load %arg3[%c0_3, %c0_4] : memref<1x128xf32, #tpu.memory_space<vmem>>, vector<1x128xf32>
    %4 = vector.broadcast %3 : vector<1x128xf32> to vector<16x128xf32>
    %5 = arith.addf %2, %4 : vector<16x128xf32>
    %cst_5 = arith.constant 0.000000e+00 : f32
    %6 = vector.broadcast %cst_5 : f32 to vector<16x128xf32>
    %7 = arith.cmpf oge, %5, %6 : vector<16x128xf32>
    %cst_6 = arith.constant 2.000000e-01 : f32
    %8 = vector.broadcast %cst_6 : f32 to vector<16x128xf32>
    %9 = arith.mulf %8, %5 : vector<16x128xf32>
    %10 = arith.select %7, %5, %9 : vector<16x128xi1>, vector<16x128xf32>
    %11 = arith.truncf %10 : vector<16x128xf32> to vector<16x128xbf16>
    %c0_7 = arith.constant 0 : index
    %c0_8 = arith.constant 0 : index
    %12 = vector.load %arg4[%c0_7, %c0_8] : memref<128x128xbf16, #tpu.memory_space<vmem>>, vector<128x128xbf16>
    %cst_9 = arith.constant dense<0.000000e+00> : vector<16x128xf32>
    %13 = tpu.matmul %11, %12, %cst_9 {dimension_numbers = #tpu.dot_dimension_numbers<[1], [0], [0], [1], [0, 0, 1, 1], [], []>} : vector<16x128xbf16>, vector<128x128xbf16>, vector<16x128xf32> -> vector<16x128xf32>
    %c0_10 = arith.constant 0 : index
    %c0_11 = arith.constant 0 : index
    %14 = vector.load %arg5[%c0_10, %c0_11] : memref<1x128xf32, #tpu.memory_space<vmem>>, vector<1x128xf32>
    %15 = vector.broadcast %14 : vector<1x128xf32> to vector<16x128xf32>
    %16 = arith.addf %13, %15 : vector<16x128xf32>
    %cst_12 = arith.constant 0.000000e+00 : f32
    %17 = vector.broadcast %cst_12 : f32 to vector<16x128xf32>
    %18 = arith.cmpf oge, %16, %17 : vector<16x128xf32>
    %cst_13 = arith.constant 2.000000e-01 : f32
    %19 = vector.broadcast %cst_13 : f32 to vector<16x128xf32>
    %20 = arith.mulf %19, %16 : vector<16x128xf32>
    %21 = arith.select %18, %16, %20 : vector<16x128xi1>, vector<16x128xf32>
    %22 = arith.truncf %21 : vector<16x128xf32> to vector<16x128xbf16>
    %c0_14 = arith.constant 0 : index
    %c0_15 = arith.constant 0 : index
    %23 = vector.load %arg6[%c0_14, %c0_15] : memref<128x128xbf16, #tpu.memory_space<vmem>>, vector<128x128xbf16>
    %cst_16 = arith.constant dense<0.000000e+00> : vector<16x128xf32>
    %24 = tpu.matmul %22, %23, %cst_16 {dimension_numbers = #tpu.dot_dimension_numbers<[1], [0], [0], [1], [0, 0, 1, 1], [], []>} : vector<16x128xbf16>, vector<128x128xbf16>, vector<16x128xf32> -> vector<16x128xf32>
    %c0_17 = arith.constant 0 : index
    %c0_18 = arith.constant 0 : index
    %25 = vector.load %arg7[%c0_17, %c0_18] : memref<1x128xf32, #tpu.memory_space<vmem>>, vector<1x128xf32>
    %26 = vector.broadcast %25 : vector<1x128xf32> to vector<16x128xf32>
    %27 = arith.addf %24, %26 : vector<16x128xf32>
    %28 = arith.negf %27 : vector<16x128xf32>
    %29 = math.exp %28 : vector<16x128xf32>
    %cst_19 = arith.constant 1.000000e+00 : f32
    %30 = vector.broadcast %cst_19 : f32 to vector<16x128xf32>
    %31 = arith.addf %30, %29 : vector<16x128xf32>
    %32 = arith.divf %30, %31 : vector<16x128xf32>
    %c0_20 = arith.constant 0 : index
    %c0_21 = arith.constant 0 : index
    %33 = vector.load %arg8[%c0_20, %c0_21] : memref<16x128xf32, #tpu.memory_space<vmem>>, vector<16x128xf32>
    tpu.vector_store %arg8[%c0_20, %c0_21], %32 {strides = array<i32>} : memref<16x128xf32, #tpu.memory_space<vmem>>, vector<16x128xf32>,
    return
  }
  func.func @transform_0(%arg0: i32) -> (i32, i32) {
    %c0_i32 = arith.constant 0 : i32
    %c0_i32_0 = arith.constant 0 : i32
    return %arg0, %c0_i32 : i32, i32
  }
  func.func @transform_1(%arg0: i32) -> (i32, i32) {
    %c0_i32 = arith.constant 0 : i32
    %c0_i32_0 = arith.constant 0 : i32
    %c0_i32_1 = arith.constant 0 : i32
    return %c0_i32, %c0_i32_0 : i32, i32
  }
  func.func @transform_2(%arg0: i32) -> (i32, i32) {
    %c0_i32 = arith.constant 0 : i32
    %c0_i32_0 = arith.constant 0 : i32
    %c0_i32_1 = arith.constant 0 : i32
    return %c0_i32, %c0_i32_0 : i32, i32
  }
  func.func @transform_3(%arg0: i32) -> (i32, i32) {
    %c0_i32 = arith.constant 0 : i32
    %c0_i32_0 = arith.constant 0 : i32
    %c0_i32_1 = arith.constant 0 : i32
    return %c0_i32, %c0_i32_0 : i32, i32
  }
  func.func @transform_4(%arg0: i32) -> (i32, i32) {
    %c0_i32 = arith.constant 0 : i32
    %c0_i32_0 = arith.constant 0 : i32
    %c0_i32_1 = arith.constant 0 : i32
    return %c0_i32, %c0_i32_0 : i32, i32
  }
  func.func @transform_5(%arg0: i32) -> (i32, i32) {
    %c0_i32 = arith.constant 0 : i32
    %c0_i32_0 = arith.constant 0 : i32
    %c0_i32_1 = arith.constant 0 : i32
    return %c0_i32, %c0_i32_0 : i32, i32
  }
  func.func @transform_6(%arg0: i32) -> (i32, i32) {
    %c0_i32 = arith.constant 0 : i32
    %c0_i32_0 = arith.constant 0 : i32
    %c0_i32_1 = arith.constant 0 : i32
    return %c0_i32, %c0_i32_0 : i32, i32
  }
  func.func @transform_7(%arg0: i32) -> (i32, i32) {
    %c0_i32 = arith.constant 0 : i32
    %c0_i32_0 = arith.constant 0 : i32
    return %arg0, %c0_i32 : i32, i32
  }
}

</mosaic_0001>

<bundles_post_ra>
// kernel: tpu_custom_call.1
= control target key start
LH: loop header
LB: loop body
LE: loop exit
PB: predicated region body
PF: predicated region fallthrough
CT: control target
= control target key end

     0   :  { %12 = vsyncpa [#allocation3], 0  ;;  %s929_s0 = inlined_call_operand.hbm [shape: bf16[16,128], index: 0, kind: input, shape index: {}]   ;;  %s930_s1 = inlined_call_operand.hbm [shape: bf16[128,128], index: 1, kind: input, shape index: {}]   ;;  %s931_s2 = inlined_call_operand.vmem [shape: f32[1,128], index: 2, kind: input, shape index: {}]   ;;  %s932_s3 = inlined_call_operand.hbm [shape: bf16[128,128], index: 3, kind: input, shape index: {}]   ;;  %s933_s4 = inlined_call_operand.vmem [shape: f32[1,128], index: 4, kind: input, shape index: {}]   ;;  %s934_s5 = inlined_call_operand.hbm [shape: bf16[128,128], index: 5, kind: input, shape index: {}]   ;;  %s935_s6 = inlined_call_operand.vmem [shape: f32[1,128], index: 6, kind: input, shape index: {}]   ;;  %s936_s7 = inlined_call_operand.hbm [shape: f32[16,128], index: 7, kind: output, shape index: {}]  }
   0x1   :  { %13 = vsyncpa [#allocation6], 0 }
   0x2   :  { %14 = vsyncpa [#allocation9], 0 }
   0x3   :  { %15 = vsyncpa [#allocation4], 0  ;;  %s753_s24 = smov [#allocation5]   ;;  %s754_s26 = smov [#allocation2]  }
   0x4   :  { %s33_s25 = sshll.u32 %s753_s24, 4  ;;  %s21_s27 = sshll.u32 %s754_s26, 4  ;;  %s34_s25 = int_to_ptr.vmem [resolvable:$true] %s33_s25  ;;  %s804_s27 = int_to_ptr.vmem [resolvable:$true] %s21_s27 }
   0x5   :  { %s635_s30 = scalar_lea.hbm %s930_s1, 1024 }
   0x6   :  { %p636_p0 = scmp.ne.s32.totalorder %s930_s1, %s635_s30  ;;  %p639_p1 = scmp.lt.u32.totalorder %s635_s30, %s930_s1 }
   0x8   :  { %p641_p2 = pnand %p639_p1, %p636_p0 }
   0xa   :  { %644 = shalt.err (!%p641_p2)
}
   0xb   :  { %s645_s12 = scalar_lea.vmem %s34_s25, 1024  ;;  %p650_p4 = scmp.lt.s32.totalorder %s34_s25, %s34_s25 }
   0xc   :  { %p646_p3 = scmp.ne.s32.totalorder %s34_s25, %s645_s12  ;;  %p651_p5 = scmp.lt.s32.totalorder %s645_s12, %s645_s12 }
   0xe   :  { %p652_p6 = por %p651_p5, %p650_p4 }
  0x10   :  { %p653_p7 = pnand %p652_p6, %p646_p3 }
  0x12   :  { %656 = shalt.err (!%p653_p7)
}
  0x13   :  { %s755_s13 = smov 64   ;;  %s756_s14 = smov 4  }
  0x14   :  { %39 = dma.hbm_to_vmem [thread:$0]  %s930_s1, 1024, %s34_s25, [#allocation6], %s755_s13, %s755_s13, %s756_s14  }
  0x15   :  { %s657_s19 = scalar_lea.hbm %s929_s0, 128 }
  0x16   :  { %p658_p8 = scmp.ne.s32.totalorder %s929_s0, %s657_s19  ;;  %p661_p9 = scmp.lt.u32.totalorder %s657_s19, %s929_s0 }
  0x18   :  { %p663_p10 = pnand %p661_p9, %p658_p8 }
  0x1a   :  { %666 = shalt.err (!%p663_p10)
}
  0x1b   :  { %s667_s24 = scalar_lea.vmem %s804_s27, 128  ;;  %p672_p12 = scmp.lt.s32.totalorder %s804_s27, %s804_s27 }
  0x1c   :  { %p668_p11 = scmp.ne.s32.totalorder %s804_s27, %s667_s24  ;;  %p673_p13 = scmp.lt.s32.totalorder %s667_s24, %s667_s24 }
  0x1e   :  { %p674_p0 = por %p673_p13, %p672_p12 }
  0x20   :  { %p675_p1 = pnand %p674_p0, %p668_p11 }
  0x22   :  { %678 = shalt.err (!%p675_p1)
}
  0x23   :  { %27 = dma.hbm_to_vmem [thread:$0]  %s929_s0, 128, %s804_s27, [#allocation3], %s755_s13, %s755_s13, %s756_s14  }
  0x24   :  { %s757_s26 = smov [#allocation7]   ;;  %s758_s29 = smov [#allocation8]  }
  0x25   :  { %s47_s28 = sshll.u32 %s757_s26, 4  ;;  %s61_s30 = sshll.u32 %s758_s29, 4  ;;  %s48_s28 = int_to_ptr.vmem [resolvable:$true] %s47_s28  ;;  %s841_s30 = int_to_ptr.vmem [resolvable:$true] %s61_s30 }
  0x26   :  { %s679_s10 = scalar_lea.hbm %s932_s3, 1024 }
  0x27   :  { %p680_p2 = scmp.ne.s32.totalorder %s932_s3, %s679_s10  ;;  %p683_p3 = scmp.lt.u32.totalorder %s679_s10, %s932_s3 }
  0x29   :  { %p685_p4 = pnand %p683_p3, %p680_p2 }
  0x2b   :  { %688 = shalt.err (!%p685_p4)
}
  0x2c   :  { %s689_s0 = scalar_lea.vmem %s48_s28, 1024  ;;  %p694_p6 = scmp.lt.s32.totalorder %s48_s28, %s48_s28 }
  0x2d   :  { %p690_p5 = scmp.ne.s32.totalorder %s48_s28, %s689_s0  ;;  %p695_p7 = scmp.lt.s32.totalorder %s689_s0, %s689_s0 }
  0x2f   :  { %p696_p8 = por %p695_p7, %p694_p6 }
  0x31   :  { %p697_p9 = pnand %p696_p8, %p690_p5 }
  0x33   :  { %700 = shalt.err (!%p697_p9)
}
  0x34   :  { %53 = dma.hbm_to_vmem [thread:$0]  %s932_s3, 1024, %s48_s28, [#allocation6], %s755_s13, %s755_s13, %s756_s14  }
  0x35   :  { %s701_s20 = scalar_lea.hbm %s934_s5, 1024 }
  0x36   :  { %p702_p10 = scmp.ne.s32.totalorder %s934_s5, %s701_s20  ;;  %p705_p11 = scmp.lt.u32.totalorder %s701_s20, %s934_s5 }
  0x38   :  { %p707_p12 = pnand %p705_p11, %p702_p10 }
  0x3a   :  { %710 = shalt.err (!%p707_p12)
}
  0x3b   :  { %s711_s1 = scalar_lea.vmem %s841_s30, 1024  ;;  %p716_p0 = scmp.lt.s32.totalorder %s841_s30, %s841_s30 }
  0x3c   :  { %p712_p13 = scmp.ne.s32.totalorder %s841_s30, %s711_s1  ;;  %p717_p1 = scmp.lt.s32.totalorder %s711_s1, %s711_s1 }
  0x3e   :  { %p718_p2 = por %p717_p1, %p716_p0 }
  0x40   :  { %p719_p3 = pnand %p718_p2, %p712_p13 }
  0x42   :  { %722 = shalt.err (!%p719_p3)
}
  0x43   :  { %67 = dma.hbm_to_vmem [thread:$0]  %s934_s5, 1024, %s841_s30, [#allocation9], %s755_s13, %s755_s13, %s756_s14  }
  0x44   :  { %745 = dma.done.wait [#allocation3], 128  }
  0x45   :  { %746 = vsyncadd [#allocation3], 4294967168 }
  0x46   :  { %747 = dma.done.wait [#allocation6], 2048  }
  0x47   :  { %748 = vsyncadd [#allocation6], 4294965248 }
  0x48   :  { %749 = dma.done.wait [#allocation9], 1024  }
  0x49   :  { %750 = vsyncadd [#allocation9], 4294966272  ;;  %v759_v0 = vmov 0.0   ;;  %vm760_vm0 = vmmov 0   ;;  %v602_v1 = vld [vmem:[#allocation5] sm:$0xff]   ;;  %v603_v2 = vld [vmem:[#allocation5 + $0x8] sm:$0xff]  }
  0x4a   :  { %531 = vmatprep.subr.bf16.mxu0 %v759_v0  ;;  %547 = vmatprep.mubr.msk.bf16.mxu0 %vm760_vm0, %v759_v0  ;;  %v604_v3 = vld [vmem:[#allocation5 + $0x10] sm:$0xff]   ;;  %v611_v4 = vld [vmem:[#allocation7] sm:$0xff]   ;;  %v605_v5 = vld [vmem:[#allocation5 + $0x18] sm:$0xff]  }
  0x4b   :  { %551 = vmatprep.subr.bf16.mxu1 %v759_v0  ;;  %567 = vmatprep.mubr.msk.bf16.mxu1 %vm760_vm0, %v759_v0  ;;  %v612_v6 = vld [vmem:[#allocation7 + $0x8] sm:$0xff]   ;;  %v606_v7 = vld [vmem:[#allocation5 + $0x20] sm:$0xff]   ;;  %v613_v8 = vld [vmem:[#allocation7 + $0x10] sm:$0xff]  }
  0x4c   :  { %532 = vmatpush3.bf16.msra.mxu0 %v602_v1  ;;  %552 = vmatpush3.bf16.msra.mxu1 %v611_v4  ;;  %v607_v9 = vld [vmem:[#allocation5 + $0x28] sm:$0xff]   ;;  %v614_v10 = vld [vmem:[#allocation7 + $0x18] sm:$0xff]   ;;  %v608_v11 = vld [vmem:[#allocation5 + $0x30] sm:$0xff]  }
  0x4d   :  { %533 = vmatprep.subr.bf16.mxu0 %v759_v0  ;;  %553 = vmatprep.subr.bf16.mxu1 %v759_v0  ;;  %v615_v12 = vld [vmem:[#allocation7 + $0x20] sm:$0xff]   ;;  %v609_v13 = vld [vmem:[#allocation5 + $0x38] sm:$0xff]   ;;  %v616_v14 = vld [vmem:[#allocation7 + $0x28] sm:$0xff]  }
  0x4e   :  { %v610_v15 = vld [vmem:[#allocation2] sm:$0xff]   ;;  %v617_v16 = vld [vmem:[#allocation7 + $0x30] sm:$0xff]   ;;  %v619_v18 = vld [vmem:[#allocation8] sm:$0xff]  }
  0x4f   :  { %v618_v17 = vld [vmem:[#allocation7 + $0x38] sm:$0xff]   ;;  %v620_v19 = vld [vmem:[#allocation8 + $0x8] sm:$0xff]   ;;  %v621_v20 = vld [vmem:[#allocation8 + $0x10] sm:$0xff]  }
  0x50   :  { %534 = vmatpush3.bf16.msra.mxu0 %v603_v2  ;;  %554 = vmatpush3.bf16.msra.mxu1 %v612_v6  ;;  %v622_v21 = vld [vmem:[#allocation8 + $0x18] sm:$0xff]   ;;  %v623_v22 = vld [vmem:[#allocation8 + $0x20] sm:$0xff]   ;;  %v624_v23 = vld [vmem:[#allocation8 + $0x28] sm:$0xff]  }
  0x51   :  { %535 = vmatprep.subr.bf16.mxu0 %v759_v0  ;;  %555 = vmatprep.subr.bf16.mxu1 %v759_v0  ;;  %v474_v24 = vld [vmem:[%s931_s2] ss:$0 sm:$0xff]  ;;  %v625_v36 = vld [vmem:[#allocation8 + $0x30] sm:$0xff]  }
  0x52   :  { %v626_v37 = vld [vmem:[#allocation8 + $0x38] sm:$0xff]  }
  0x53   :  { %v484_v38 = vld [vmem:[%s933_s4] ss:$0 sm:$0xff]  ;;  %s761_s4 = smov [#allocation10]  }
  0x54   :  { %536 = vmatpush3.bf16.msra.mxu0 %v604_v3  ;;  %556 = vmatpush3.bf16.msra.mxu1 %v613_v8  ;;  %v493_v50 = vld [vmem:[%s935_s6] ss:$0 sm:$0xff]  ;;  %s460_s29 = sshll.u32 %s761_s4, 4  ;;  %s461_s29 = int_to_ptr.vmem [resolvable:$true] %s460_s29 }
  0x55   :  { %537 = vmatprep.subr.bf16.mxu0 %v759_v0  ;;  %557 = vmatprep.subr.bf16.mxu1 %v759_v0  ;;  %s723_s6 = scalar_lea.vmem %s461_s29, 256  ;;  %p728_p5 = scmp.lt.s32.totalorder %s461_s29, %s461_s29 }
  0x56   :  { %p724_p4 = scmp.ne.s32.totalorder %s461_s29, %s723_s6  ;;  %p729_p6 = scmp.lt.s32.totalorder %s723_s6, %s723_s6 }
  0x58   :  { %538 = vmatpush3.bf16.msra.mxu0 %v605_v5  ;;  %558 = vmatpush3.bf16.msra.mxu1 %v614_v10  ;;  %p730_p7 = por %p729_p6, %p728_p5 }
  0x59   :  { %539 = vmatprep.subr.bf16.mxu0 %v759_v0  ;;  %559 = vmatprep.subr.bf16.mxu1 %v759_v0 }
  0x5a   :  { %p731_p8 = pnand %p730_p7, %p724_p4 }
  0x5c   :  { %540 = vmatpush3.bf16.msra.mxu0 %v606_v7  ;;  %560 = vmatpush3.bf16.msra.mxu1 %v615_v12 }
  0x5d   :  { %541 = vmatprep.subr.bf16.mxu0 %v759_v0  ;;  %561 = vmatprep.subr.bf16.mxu1 %v759_v0 }
  0x60   :  { %542 = vmatpush3.bf16.msra.mxu0 %v607_v9  ;;  %562 = vmatpush3.bf16.msra.mxu1 %v616_v14 }
  0x61   :  { %543 = vmatprep.subr.bf16.mxu0 %v759_v0  ;;  %563 = vmatprep.subr.bf16.mxu1 %v759_v0 }
  0x64   :  { %544 = vmatpush3.bf16.msra.mxu0 %v608_v11  ;;  %564 = vmatpush3.bf16.msra.mxu1 %v617_v16 }
  0x65   :  { %545 = vmatprep.subr.bf16.mxu0 %v759_v0  ;;  %565 = vmatprep.subr.bf16.mxu1 %v759_v0 }
  0x68   :  { %546 = vmatpush3.bf16.msra.mxu0 %v609_v13  ;;  %566 = vmatpush3.bf16.msra.mxu1 %v618_v17 }
  0x69   :  { %571 = vmatprep.subr.bf16.mxu0 %v759_v0 }
  0x6b   :  { %548 = vmatmul.mubr.bf16.vlgmr.msra.gmra.mrb[0].mxu0 %v610_v15 }
  0x6c   :  { %587 = vmatprep.mubr.msk.bf16.mxu0 %vm760_vm0, %v759_v0  ;;  %572 = vmatpush3.bf16.msra.mxu0 %v619_v18 }
  0x6d   :  { %573 = vmatprep.subr.bf16.mxu0 %v759_v0 }
  0x70   :  { %574 = vmatpush3.bf16.msra.mxu0 %v620_v19 }
  0x71   :  { %575 = vmatprep.subr.bf16.mxu0 %v759_v0 }
  0x74   :  { %576 = vmatpush3.bf16.msra.mxu0 %v621_v20 }
  0x75   :  { %577 = vmatprep.subr.bf16.mxu0 %v759_v0 }
  0x78   :  { %578 = vmatpush3.bf16.msra.mxu0 %v622_v21 }
  0x79   :  { %579 = vmatprep.subr.bf16.mxu0 %v759_v0 }
  0x7c   :  { %580 = vmatpush3.bf16.msra.mxu0 %v623_v22 }
  0x7d   :  { %581 = vmatprep.subr.bf16.mxu0 %v759_v0 }
  0x80   :  { %582 = vmatpush3.bf16.msra.mxu0 %v624_v23 }
  0x81   :  { %583 = vmatprep.subr.bf16.mxu0 %v759_v0 }
  0x84   :  { %584 = vmatpush3.bf16.msra.mxu0 %v625_v36 }
  0x85   :  { %585 = vmatprep.subr.bf16.mxu0 %v759_v0 }
  0x88   :  { %586 = vmatpush3.bf16.msra.mxu0 %v626_v37 }
 0x13e   :  { %v196_v25 = vpop.f32.mrb[0].mxu0 }
 0x13f   :  { %v197_v26 = vadd.f32 %v474_v24, %v196_v25  ;;  %v549_v27 = vpop.f32.mrb[1].mxu0 }
 0x140   :  { %v199_v28 = vpop.f32.mrb[2].mxu0 }
 0x141   :  { %v205_v29 = vmul.f32 0.2, %v197_v26  ;;  %v200_v30 = vadd.f32 %v474_v24, %v199_v28  ;;  %v550_v31 = vpop.f32.mrb[3].mxu0  ;;  %vm203_vm1 = vcmp.ge.f32.partialorder %v197_v26, 0.0 }
 0x143   :  { %vm204_vm2 = vcmp.ge.f32.partialorder %v200_v30, 0.0  ;;  %v206_v32 = vmul.f32 0.2, %v200_v30  ;;  %v207_v33 = vsel %vm203_vm1, %v197_v26, %v205_v29 }
 0x145   :  { %v208_v34 = vsel %vm204_vm2, %v200_v30, %v206_v32 }
 0x146   :  { %v209_v35 = vpack.c.bf16 %v208_v34, %v207_v33 }
 0x148   :  { %568 = vmatmul.mubr.bf16.vlgmr.msra.gmra.mrb[0].mxu1 %v209_v35 }
 0x21b   :  { %v315_v39 = vpop.f32.mrb[0].mxu1 }
 0x21c   :  { %v316_v40 = vadd.f32 %v484_v38, %v315_v39  ;;  %v569_v41 = vpop.f32.mrb[1].mxu1 }
 0x21d   :  { %v318_v42 = vpop.f32.mrb[2].mxu1 }
 0x21e   :  { %v324_v43 = vmul.f32 0.2, %v316_v40  ;;  %v319_v44 = vadd.f32 %v484_v38, %v318_v42  ;;  %v570_v45 = vpop.f32.mrb[3].mxu1  ;;  %vm322_vm3 = vcmp.ge.f32.partialorder %v316_v40, 0.0 }
 0x220   :  { %vm323_vm4 = vcmp.ge.f32.partialorder %v319_v44, 0.0  ;;  %v325_v46 = vmul.f32 0.2, %v319_v44  ;;  %v326_v47 = vsel %vm322_vm3, %v316_v40, %v324_v43 }
 0x222   :  { %v327_v48 = vsel %vm323_vm4, %v319_v44, %v325_v46 }
 0x223   :  { %v328_v49 = vpack.c.bf16 %v327_v48, %v326_v47 }
 0x225   :  { %588 = vmatmul.mubr.bf16.vlgmr.msra.gmra.mrb[4].mxu0 %v328_v49 }
 0x2f8   :  { %v434_v51 = vpop.f32.mrb[4].mxu0 }
 0x2f9   :  { %v435_v52 = vadd.f32 %v493_v50, %v434_v51  ;;  %v589_v53 = vpop.f32.mrb[5].mxu0 }
 0x2fa   :  { %v437_v54 = vpop.f32.mrb[6].mxu0 }
 0x2fb   :  { %v502_v55 = vmul.f32 -1.442695, %v435_v52  ;;  %v438_v56 = vadd.f32 %v493_v50, %v437_v54  ;;  %v590_v57 = vpop.f32.mrb[7].mxu0 }
 0x2fd   :  { %627 = vpow2.f32 %v502_v55  ;;  %v503_v58 = vmul.f32 -1.442695, %v438_v56 }
 0x2ff   :  { %629 = vpow2.f32 %v503_v58 }
 0x307   :  { %v628_v59 = vpop.eup %627 }
 0x308   :  { %v447_v60 = vadd.f32 1.0, %v628_v59 }
 0x309   :  { %v630_v61 = vpop.eup %629 }
 0x30a   :  { %631 = vrcp.f32 %v447_v60  ;;  %v448_v62 = vadd.f32 1.0, %v630_v61 }
 0x30c   :  { %633 = vrcp.f32 %v448_v62 }
 0x314   :  { %v632_v63 = vpop.eup %631 }
 0x315   :  { %453 = vst [vmem:[#allocation10] sm:$0xff] %v632_v63 }
 0x316   :  { %v634_v0 = vpop.eup %633 }
 0x317   :  { %454 = vst [vmem:[#allocation10 + $0x8] sm:$0xff] %v634_v0 }
 0x318   :  { %734 = shalt.err (!%p731_p8)
}
 0x319   :  { %s735_s9 = scalar_lea.hbm %s936_s7, 256 }
 0x31a   :  { %p736_p9 = scmp.ne.s32.totalorder %s936_s7, %s735_s9  ;;  %p739_p10 = scmp.lt.u32.totalorder %s735_s9, %s936_s7 }
 0x31c   :  { %p741_p11 = pnand %p739_p10, %p736_p9 }
 0x31e   :  { %744 = shalt.err (!%p741_p11)
}
 0x31f   :  { %s762_s16 = smov 128   ;;  %s763_s0 = smov 8  }
 0x320   :  { %466 = dma.vmem_to_hbm [thread:$0]  %s461_s29, 256, %s936_s7, [#allocation4], %s762_s16, %s762_s16, %s763_s0  }
 0x321   :  { %751 = dma.done.wait [#allocation4], 256  }
 0x322   :  { %752 = vsyncadd [#allocation4], 4294967040 }
 0x323   :  { %470 = vsyncpa [#allocation3], 1 }
 0x324   :  { %471 = vsyncpa [#allocation6], 1 }
 0x325   :  { %472 = vsyncpa [#allocation9], 1 }
 0x326   :  { %473 = vsyncpa [#allocation4], 1 }

</bundles_post_ra>
